<compile_context>
chip_gen: v6e
topology: v6e:2x2x1
jax: 0.10.0
libtpu: 0.0.40
codegen_flags: <defaults>
</compile_context>

<pallas_src>
import math

import jax
import jax.numpy as jnp
from jax.experimental import pallas as pl
from jax.experimental.pallas import tpu as pltpu


def _cdiv(a: int, b: int) -> int:
    return -(-a // b)


# --------------------------------------------------------------------------
# Path A: VMEM-resident table, in-core gather.
# --------------------------------------------------------------------------

def _make_vmem_gather_kernel(M: int, R: int):
    def kernel(idx_ref, t_ref, o_ref):
        # idx_ref: (M,) int32 in SMEM (scalar prefetch)
        # t_ref:   (N, *row_shape) full table, resident in VMEM
        # o_ref:   (R, *row_shape) output block in VMEM (lane-dense writeback)
        base = pl.program_id(0) * R
        for r in range(R):
            # Branchless tail: clamp to a valid row; the out-of-range part of
            # the last output block is discarded on writeback anyway.
            row = jnp.minimum(base + r, M - 1)
            o_ref[r] = t_ref[idx_ref[row]]
    return kernel


def _vmem_selector(table, idx, M, row_shape, rows_per_step):
    N = int(table.shape[0])
    nd = table.ndim
    row_bytes = max(1, math.prod(row_shape) * jnp.dtype(table.dtype).itemsize)

    if rows_per_step is None:
        # ~512 KiB output block per grid step, clamped to [1, 128].
        R = max(1, min(128, _cdiv(512 * 1024, row_bytes)))
    else:
        R = int(rows_per_step)
    R = max(1, min(R, M))
    if R < M and nd == 2:
        # For 2-D tables the output block's second-to-last dim must be a
        # multiple of 8 (or equal the full extent).
        R = max(8, (R // 8) * 8)
        R = min(R, M)
    n_chunks = _cdiv(M, R)

    grid_spec = pltpu.PrefetchScalarGridSpec(
        num_scalar_prefetch=1,                 # idx lands in SMEM before the grid
        grid=(n_chunks,),
        in_specs=[pl.BlockSpec((N,) + row_shape,
                               lambda i, idx_ref: (0,) * nd)],   # resident table
        out_specs=pl.BlockSpec((R,) + row_shape,
                               lambda i, idx_ref: (i,) + (0,) * (nd - 1)),
    )
    cost = pl.CostEstimate(
        flops=0, transcendentals=0,
        bytes_accessed=N * row_bytes + 2 * M * row_bytes + 4 * M,
    )
    return pl.pallas_call(
        _make_vmem_gather_kernel(M, R),
        grid_spec=grid_spec,
        out_shape=jax.ShapeDtypeStruct((M,) + row_shape, table.dtype),
        compiler_params=pltpu.CompilerParams(dimension_semantics=("arbitrary",)),
        cost_estimate=cost,
    )(idx, table)


# --------------------------------------------------------------------------
# Path B: HBM->HBM per-row DMA gather, double-banked / cross-step pipelined.
# --------------------------------------------------------------------------

def _make_dma_gather_kernel(M: int, R: int, n_chunks: int):
    rem = M % R                       # valid rows in the (possibly short) last chunk
    n_always = rem if rem != 0 else R  # rows present in *every* chunk

    def kernel(idx_ref, t_hbm, o_hbm, sems):
        # idx_ref: (M,) int32 in SMEM (scalar prefetch)
        # t_hbm:   (N, *row_shape) in HBM (pl.ANY)
        # o_hbm:   (M, *row_shape) in HBM (pl.ANY)
        # sems:    (2, R) DMA semaphores, double-banked across grid steps
        i = pl.program_id(0)
        bank = i & 1
        base = i * R

        def start_row(r):
            row = base + r
            pltpu.make_async_copy(
                t_hbm.at[idx_ref[row]],   # data-dependent gathered source row
                o_hbm.at[row],            # disjoint destination row
                sems.at[bank, r],
            ).start()

        def wait_slot(b, r):
            # Constant src/dst: the wait only needs the semaphore and the byte
            # count (all row copies are row-sized) — no per-row scalar work.
            pltpu.make_async_copy(t_hbm.at[0], o_hbm.at[0], sems.at[b, r]).wait()

        # --- issue this step's copies (before any wait, so 2R can be in flight)
        for r in range(n_always):
            start_row(r)
        if rem != 0:
            # Single chunk-level branch: every chunk except the last is full.
            @pl.when(i < n_chunks - 1)
            def _():
                for r in range(rem, R):
                    start_row(r)

        # --- overlap: wait on the previous step's copies (always a full chunk)
        @pl.when(i > 0)
        def _():
            for r in range(R):
                wait_slot(1 - bank, r)

        # --- final step: drain our own bank so every output row has landed
        @pl.when(i == n_chunks - 1)
        def _():
            for r in range(n_always):
                wait_slot(bank, r)

    return kernel


def _dma_selector(table, idx, M, row_shape, rows_per_step):
    row_bytes = max(1, math.prod(row_shape) * jnp.dtype(table.dtype).itemsize)

    if rows_per_step is None:
        # ~1 MiB of row payload issued per step; double banking keeps up to
        # 2R row-DMAs outstanding to hide HBM latency of small random fetches.
        R = max(8, min(128, _cdiv(1024 * 1024, row_bytes)))
    else:
        R = int(rows_per_step)
    R = max(1, min(R, M))
    n_chunks = _cdiv(M, R)

    grid_spec = pltpu.PrefetchScalarGridSpec(
        num_scalar_prefetch=1,                         # idx -> SMEM
        grid=(n_chunks,),
        in_specs=[pl.BlockSpec(memory_space=pl.ANY)],  # table stays in HBM
        out_specs=pl.BlockSpec(memory_space=pl.ANY),   # output stays in HBM
        scratch_shapes=[pltpu.SemaphoreType.DMA((2, R))],
    )
    cost = pl.CostEstimate(
        flops=0, transcendentals=0,
        bytes_accessed=2 * M * row_bytes + 4 * M,
    )
    return pl.pallas_call(
        _make_dma_gather_kernel(M, R, n_chunks),
        grid_spec=grid_spec,
        out_shape=jax.ShapeDtypeStruct((M,) + row_shape, table.dtype),
        compiler_params=pltpu.CompilerParams(
            # Cross-step semaphore handoff (bank pipelining) => sequential axis.
            dimension_semantics=("arbitrary",),
        ),
        cost_estimate=cost,
    )(idx, table)


# --------------------------------------------------------------------------
# Dispatch + module wrapper.
# --------------------------------------------------------------------------

_DEFAULT_VMEM_TABLE_BYTES = 8 * 1024 * 1024  # conservative across v5e/v6e/v7x


def selector_forward(table: jax.Array, idx: jax.Array, *,
                     rows_per_step: int | None = None,
                     vmem_table_bytes: int = _DEFAULT_VMEM_TABLE_BYTES) -> jax.Array:
    """Pallas equivalent of Selector.forward: returns table[idx].

    table: (N, *row_shape)  — gather along axis 0 (ndim >= 2)
    idx:   (M,) integer     — 0 <= idx[i] < N (repeats allowed; not re-checked here)
    out:   (M, *row_shape)
    """
    assert table.ndim >= 2, "wrapper expects a gather axis plus trailing dims"
    # TODO(synk): 1-D tables (scalar rows) not supported by these paths.
    M = int(idx.shape[0])
    row_shape = tuple(int(d) for d in table.shape[1:])
    idx = idx.astype(jnp.int32)

    if M == 0:
        return jnp.zeros((0,) + row_shape, table.dtype)

    table_bytes = math.prod(int(d) for d in table.shape) * jnp.dtype(table.dtype).itemsize
    if table_bytes <= vmem_table_bytes:
        return _vmem_selector(table, idx, M, row_shape, rows_per_step)
    return _dma_selector(table, idx, M, row_shape, rows_per_step)


class SelectorPallas:
    """Minimal stand-in for easier.Selector: holds static `idx`; forward = gather."""

    def __init__(self, idx: jax.Array):
        assert jnp.issubdtype(idx.dtype, jnp.integer), \
            "The index tensor to Selector must be an integer tensor"
        idx = idx.astype(jnp.int32)
        # Mirrors _validate_idx's `idx >= 0` check (construction-time only;
        # skipped for abstract tracers). `idx < N` can only be checked at
        # forward time because N is not known here.
        if not isinstance(idx, jax.core.Tracer):
            assert bool(jnp.all(idx >= 0)), "Selector index values must be >= 0"
        self.idx = idx

    def __call__(self, tensor: jax.Array) -> jax.Array:
        return selector_forward(tensor, self.idx)


if __name__ == "__main__":
    key = jax.random.PRNGKey(0)
    k_tab, k_idx = jax.random.split(key)

    # Table of N=16 rows, each row an (8, 128) f32 tile (4 KiB); index vector
    # of length M=37 with repeats and arbitrary order.
    N, S, D = 16, 8, 128
    M = 37
    table = jax.random.normal(k_tab, (N, S, D), dtype=jnp.float32)
    idx = jax.random.randint(k_idx, (M,), 0, N, dtype=jnp.int32)

    ref = table[idx]  # plain JAX gather (== torch `tensor[self.idx]`)

    # 1) Default dispatch: small table -> VMEM-resident fast path, single chunk.
    sel = SelectorPallas(idx)
    out = jax.block_until_ready(sel(table))
    assert out.shape == (M, S, D) and out.dtype == table.dtype
    assert bool(jnp.array_equal(out, ref)), "VMEM-path gather mismatch vs reference"

    # 2) VMEM path, multi-chunk + partial tail.
    out2 = jax.block_until_ready(selector_forward(table, idx, rows_per_step=8))
    assert bool(jnp.array_equal(out2, ref)), "VMEM-path (chunked) mismatch vs reference"

    # 3) Forced HBM->HBM DMA path (double-banked, pipelined), multi-chunk + tail.
    out3 = jax.block_until_ready(
        selector_forward(table, idx, rows_per_step=8, vmem_table_bytes=0))
    assert bool(jnp.array_equal(out3, ref)), "DMA-path gather mismatch vs reference"

    # 4) DMA path with an exactly-divisible chunking (no tail branch traced).
    idx4 = idx[:32]
    out4 = jax.block_until_ready(
        selector_forward(table, idx4, rows_per_step=8, vmem_table_bytes=0))
    assert bool(jnp.array_equal(out4, table[idx4])), "DMA-path (even) mismatch vs reference"

    print("KERNEL_OK")
</pallas_src>

<mosaic_0001>
module attributes {stable_mosaic.version = 11 : i64} {
  func.func @kernel(%arg0: i32, %arg1: memref<37xi32, #tpu.memory_space<smem>>, %arg2: memref<16x8x128xf32, #tpu.memory_space<vmem>>, %arg3: memref<37x8x128xf32, #tpu.memory_space<vmem>>) attributes {dimension_semantics = [#tpu.dimension_semantics<arbitrary>], iteration_bounds = array<i64: 1>, scalar_prefetch = 1 : i64, scratch_operands = 0 : i64, tpu.core_type = #tpu.core_type<tc>, window_params = [{pipeline_mode = #tpu.pipeline_mode<synchronous>, transform_indices = @transform_0, window_bounds = array<i64: 16, 8, 128>}, {transform_indices = @transform_1, window_bounds = array<i64: 37, 8, 128>}]} {
    %c37_i32 = arith.constant 37 : i32
    %0 = arith.muli %arg0, %c37_i32 : i32
    %c0_i32 = arith.constant 0 : i32
    %1 = arith.addi %0, %c0_i32 : i32
    %c36_i32 = arith.constant 36 : i32
    %2 = arith.minsi %1, %c36_i32 : i32
    %3 = arith.index_cast %2 : i32 to index
    %4 = memref.load %arg1[%3] : memref<37xi32, #tpu.memory_space<smem>>
    %5 = arith.index_cast %4 : i32 to index
    %c0 = arith.constant 0 : index
    %c0_0 = arith.constant 0 : index
    %6 = vector.load %arg2[%5, %c0, %c0_0] : memref<16x8x128xf32, #tpu.memory_space<vmem>>, vector<1x8x128xf32>
    %7 = vector.shape_cast %6 : vector<1x8x128xf32> to vector<8x128xf32>
    %c0_1 = arith.constant 0 : index
    %c0_2 = arith.constant 0 : index
    %c0_3 = arith.constant 0 : index
    %8 = vector.load %arg3[%c0_1, %c0_2, %c0_3] : memref<37x8x128xf32, #tpu.memory_space<vmem>>, vector<1x8x128xf32>
    %9 = vector.shape_cast %8 : vector<1x8x128xf32> to vector<8x128xf32>
    %10 = vector.shape_cast %7 : vector<8x128xf32> to vector<1x8x128xf32>
    tpu.vector_store %arg3[%c0_1, %c0_2, %c0_3], %10 {strides = array<i32>} : memref<37x8x128xf32, #tpu.memory_space<vmem>>, vector<1x8x128xf32>,
    %c1_i32 = arith.constant 1 : i32
    %11 = arith.addi %0, %c1_i32 : i32
    %c36_i32_4 = arith.constant 36 : i32
    %12 = arith.minsi %11, %c36_i32_4 : i32
    %13 = arith.index_cast %12 : i32 to index
    %14 = memref.load %arg1[%13] : memref<37xi32, #tpu.memory_space<smem>>
    %15 = arith.index_cast %14 : i32 to index
    %c0_5 = arith.constant 0 : index
    %c0_6 = arith.constant 0 : index
    %16 = vector.load %arg2[%15, %c0_5, %c0_6] : memref<16x8x128xf32, #tpu.memory_space<vmem>>, vector<1x8x128xf32>
    %17 = vector.shape_cast %16 : vector<1x8x128xf32> to vector<8x128xf32>
    %c1 = arith.constant 1 : index
    %c0_7 = arith.constant 0 : index
    %c0_8 = arith.constant 0 : index
    %18 = vector.load %arg3[%c1, %c0_7, %c0_8] : memref<37x8x128xf32, #tpu.memory_space<vmem>>, vector<1x8x128xf32>
    %19 = vector.shape_cast %18 : vector<1x8x128xf32> to vector<8x128xf32>
    %20 = vector.shape_cast %17 : vector<8x128xf32> to vector<1x8x128xf32>
    tpu.vector_store %arg3[%c1, %c0_7, %c0_8], %20 {strides = array<i32>} : memref<37x8x128xf32, #tpu.memory_space<vmem>>, vector<1x8x128xf32>,
    %c2_i32 = arith.constant 2 : i32
    %21 = arith.addi %0, %c2_i32 : i32
    %c36_i32_9 = arith.constant 36 : i32
    %22 = arith.minsi %21, %c36_i32_9 : i32
    %23 = arith.index_cast %22 : i32 to index
    %24 = memref.load %arg1[%23] : memref<37xi32, #tpu.memory_space<smem>>
    %25 = arith.index_cast %24 : i32 to index
    %c0_10 = arith.constant 0 : index
    %c0_11 = arith.constant 0 : index
    %26 = vector.load %arg2[%25, %c0_10, %c0_11] : memref<16x8x128xf32, #tpu.memory_space<vmem>>, vector<1x8x128xf32>
    %27 = vector.shape_cast %26 : vector<1x8x128xf32> to vector<8x128xf32>
    %c2 = arith.constant 2 : index
    %c0_12 = arith.constant 0 : index
    %c0_13 = arith.constant 0 : index
    %28 = vector.load %arg3[%c2, %c0_12, %c0_13] : memref<37x8x128xf32, #tpu.memory_space<vmem>>, vector<1x8x128xf32>
    %29 = vector.shape_cast %28 : vector<1x8x128xf32> to vector<8x128xf32>
    %30 = vector.shape_cast %27 : vector<8x128xf32> to vector<1x8x128xf32>
    tpu.vector_store %arg3[%c2, %c0_12, %c0_13], %30 {strides = array<i32>} : memref<37x8x128xf32, #tpu.memory_space<vmem>>, vector<1x8x128xf32>,
    %c3_i32 = arith.constant 3 : i32
    %31 = arith.addi %0, %c3_i32 : i32
    %c36_i32_14 = arith.constant 36 : i32
    %32 = arith.minsi %31, %c36_i32_14 : i32
    %33 = arith.index_cast %32 : i32 to index
    %34 = memref.load %arg1[%33] : memref<37xi32, #tpu.memory_space<smem>>
    %35 = arith.index_cast %34 : i32 to index
    %c0_15 = arith.constant 0 : index
    %c0_16 = arith.constant 0 : index
    %36 = vector.load %arg2[%35, %c0_15, %c0_16] : memref<16x8x128xf32, #tpu.memory_space<vmem>>, vector<1x8x128xf32>
    %37 = vector.shape_cast %36 : vector<1x8x128xf32> to vector<8x128xf32>
    %c3 = arith.constant 3 : index
    %c0_17 = arith.constant 0 : index
    %c0_18 = arith.constant 0 : index
    %38 = vector.load %arg3[%c3, %c0_17, %c0_18] : memref<37x8x128xf32, #tpu.memory_space<vmem>>, vector<1x8x128xf32>
    %39 = vector.shape_cast %38 : vector<1x8x128xf32> to vector<8x128xf32>
    %40 = vector.shape_cast %37 : vector<8x128xf32> to vector<1x8x128xf32>
    tpu.vector_store %arg3[%c3, %c0_17, %c0_18], %40 {strides = array<i32>} : memref<37x8x128xf32, #tpu.memory_space<vmem>>, vector<1x8x128xf32>,
    %c4_i32 = arith.constant 4 : i32
    %41 = arith.addi %0, %c4_i32 : i32
    %c36_i32_19 = arith.constant 36 : i32
    %42 = arith.minsi %41, %c36_i32_19 : i32
    %43 = arith.index_cast %42 : i32 to index
    %44 = memref.load %arg1[%43] : memref<37xi32, #tpu.memory_space<smem>>
    %45 = arith.index_cast %44 : i32 to index
    %c0_20 = arith.constant 0 : index
    %c0_21 = arith.constant 0 : index
    %46 = vector.load %arg2[%45, %c0_20, %c0_21] : memref<16x8x128xf32, #tpu.memory_space<vmem>>, vector<1x8x128xf32>
    %47 = vector.shape_cast %46 : vector<1x8x128xf32> to vector<8x128xf32>
    %c4 = arith.constant 4 : index
    %c0_22 = arith.constant 0 : index
    %c0_23 = arith.constant 0 : index
    %48 = vector.load %arg3[%c4, %c0_22, %c0_23] : memref<37x8x128xf32, #tpu.memory_space<vmem>>, vector<1x8x128xf32>
    %49 = vector.shape_cast %48 : vector<1x8x128xf32> to vector<8x128xf32>
    %50 = vector.shape_cast %47 : vector<8x128xf32> to vector<1x8x128xf32>
    tpu.vector_store %arg3[%c4, %c0_22, %c0_23], %50 {strides = array<i32>} : memref<37x8x128xf32, #tpu.memory_space<vmem>>, vector<1x8x128xf32>,
    %c5_i32 = arith.constant 5 : i32
    %51 = arith.addi %0, %c5_i32 : i32
    %c36_i32_24 = arith.constant 36 : i32
    %52 = arith.minsi %51, %c36_i32_24 : i32
    %53 = arith.index_cast %52 : i32 to index
    %54 = memref.load %arg1[%53] : memref<37xi32, #tpu.memory_space<smem>>
    %55 = arith.index_cast %54 : i32 to index
    %c0_25 = arith.constant 0 : index
    %c0_26 = arith.constant 0 : index
    %56 = vector.load %arg2[%55, %c0_25, %c0_26] : memref<16x8x128xf32, #tpu.memory_space<vmem>>, vector<1x8x128xf32>
    %57 = vector.shape_cast %56 : vector<1x8x128xf32> to vector<8x128xf32>
    %c5 = arith.constant 5 : index
    %c0_27 = arith.constant 0 : index
    %c0_28 = arith.constant 0 : index
    %58 = vector.load %arg3[%c5, %c0_27, %c0_28] : memref<37x8x128xf32, #tpu.memory_space<vmem>>, vector<1x8x128xf32>
    %59 = vector.shape_cast %58 : vector<1x8x128xf32> to vector<8x128xf32>
    %60 = vector.shape_cast %57 : vector<8x128xf32> to vector<1x8x128xf32>
    tpu.vector_store %arg3[%c5, %c0_27, %c0_28], %60 {strides = array<i32>} : memref<37x8x128xf32, #tpu.memory_space<vmem>>, vector<1x8x128xf32>,
    %c6_i32 = arith.constant 6 : i32
    %61 = arith.addi %0, %c6_i32 : i32
    %c36_i32_29 = arith.constant 36 : i32
    %62 = arith.minsi %61, %c36_i32_29 : i32
    %63 = arith.index_cast %62 : i32 to index
    %64 = memref.load %arg1[%63] : memref<37xi32, #tpu.memory_space<smem>>
    %65 = arith.index_cast %64 : i32 to index
    %c0_30 = arith.constant 0 : index
    %c0_31 = arith.constant 0 : index
    %66 = vector.load %arg2[%65, %c0_30, %c0_31] : memref<16x8x128xf32, #tpu.memory_space<vmem>>, vector<1x8x128xf32>
    %67 = vector.shape_cast %66 : vector<1x8x128xf32> to vector<8x128xf32>
    %c6 = arith.constant 6 : index
    %c0_32 = arith.constant 0 : index
    %c0_33 = arith.constant 0 : index
    %68 = vector.load %arg3[%c6, %c0_32, %c0_33] : memref<37x8x128xf32, #tpu.memory_space<vmem>>, vector<1x8x128xf32>
    %69 = vector.shape_cast %68 : vector<1x8x128xf32> to vector<8x128xf32>
    %70 = vector.shape_cast %67 : vector<8x128xf32> to vector<1x8x128xf32>
    tpu.vector_store %arg3[%c6, %c0_32, %c0_33], %70 {strides = array<i32>} : memref<37x8x128xf32, #tpu.memory_space<vmem>>, vector<1x8x128xf32>,
    %c7_i32 = arith.constant 7 : i32
    %71 = arith.addi %0, %c7_i32 : i32
    %c36_i32_34 = arith.constant 36 : i32
    %72 = arith.minsi %71, %c36_i32_34 : i32
    %73 = arith.index_cast %72 : i32 to index
    %74 = memref.load %arg1[%73] : memref<37xi32, #tpu.memory_space<smem>>
    %75 = arith.index_cast %74 : i32 to index
    %c0_35 = arith.constant 0 : index
    %c0_36 = arith.constant 0 : index
    %76 = vector.load %arg2[%75, %c0_35, %c0_36] : memref<16x8x128xf32, #tpu.memory_space<vmem>>, vector<1x8x128xf32>
    %77 = vector.shape_cast %76 : vector<1x8x128xf32> to vector<8x128xf32>
    %c7 = arith.constant 7 : index
    %c0_37 = arith.constant 0 : index
    %c0_38 = arith.constant 0 : index
    %78 = vector.load %arg3[%c7, %c0_37, %c0_38] : memref<37x8x128xf32, #tpu.memory_space<vmem>>, vector<1x8x128xf32>
    %79 = vector.shape_cast %78 : vector<1x8x128xf32> to vector<8x128xf32>
    %80 = vector.shape_cast %77 : vector<8x128xf32> to vector<1x8x128xf32>
    tpu.vector_store %arg3[%c7, %c0_37, %c0_38], %80 {strides = array<i32>} : memref<37x8x128xf32, #tpu.memory_space<vmem>>, vector<1x8x128xf32>,
    %c8_i32 = arith.constant 8 : i32
    %81 = arith.addi %0, %c8_i32 : i32
    %c36_i32_39 = arith.constant 36 : i32
    %82 = arith.minsi %81, %c36_i32_39 : i32
    %83 = arith.index_cast %82 : i32 to index
    %84 = memref.load %arg1[%83] : memref<37xi32, #tpu.memory_space<smem>>
    %85 = arith.index_cast %84 : i32 to index
    %c0_40 = arith.constant 0 : index
    %c0_41 = arith.constant 0 : index
    %86 = vector.load %arg2[%85, %c0_40, %c0_41] : memref<16x8x128xf32, #tpu.memory_space<vmem>>, vector<1x8x128xf32>
    %87 = vector.shape_cast %86 : vector<1x8x128xf32> to vector<8x128xf32>
    %c8 = arith.constant 8 : index
    %c0_42 = arith.constant 0 : index
    %c0_43 = arith.constant 0 : index
    %88 = vector.load %arg3[%c8, %c0_42, %c0_43] : memref<37x8x128xf32, #tpu.memory_space<vmem>>, vector<1x8x128xf32>
    %89 = vector.shape_cast %88 : vector<1x8x128xf32> to vector<8x128xf32>
    %90 = vector.shape_cast %87 : vector<8x128xf32> to vector<1x8x128xf32>
    tpu.vector_store %arg3[%c8, %c0_42, %c0_43], %90 {strides = array<i32>} : memref<37x8x128xf32, #tpu.memory_space<vmem>>, vector<1x8x128xf32>,
    %c9_i32 = arith.constant 9 : i32
    %91 = arith.addi %0, %c9_i32 : i32
    %c36_i32_44 = arith.constant 36 : i32
    %92 = arith.minsi %91, %c36_i32_44 : i32
    %93 = arith.index_cast %92 : i32 to index
    %94 = memref.load %arg1[%93] : memref<37xi32, #tpu.memory_space<smem>>
    %95 = arith.index_cast %94 : i32 to index
    %c0_45 = arith.constant 0 : index
    %c0_46 = arith.constant 0 : index
    %96 = vector.load %arg2[%95, %c0_45, %c0_46] : memref<16x8x128xf32, #tpu.memory_space<vmem>>, vector<1x8x128xf32>
    %97 = vector.shape_cast %96 : vector<1x8x128xf32> to vector<8x128xf32>
    %c9 = arith.constant 9 : index
    %c0_47 = arith.constant 0 : index
    %c0_48 = arith.constant 0 : index
    %98 = vector.load %arg3[%c9, %c0_47, %c0_48] : memref<37x8x128xf32, #tpu.memory_space<vmem>>, vector<1x8x128xf32>
    %99 = vector.shape_cast %98 : vector<1x8x128xf32> to vector<8x128xf32>
    %100 = vector.shape_cast %97 : vector<8x128xf32> to vector<1x8x128xf32>
    tpu.vector_store %arg3[%c9, %c0_47, %c0_48], %100 {strides = array<i32>} : memref<37x8x128xf32, #tpu.memory_space<vmem>>, vector<1x8x128xf32>,
    %c10_i32 = arith.constant 10 : i32
    %101 = arith.addi %0, %c10_i32 : i32
    %c36_i32_49 = arith.constant 36 : i32
    %102 = arith.minsi %101, %c36_i32_49 : i32
    %103 = arith.index_cast %102 : i32 to index
    %104 = memref.load %arg1[%103] : memref<37xi32, #tpu.memory_space<smem>>
    %105 = arith.index_cast %104 : i32 to index
    %c0_50 = arith.constant 0 : index
    %c0_51 = arith.constant 0 : index
    %106 = vector.load %arg2[%105, %c0_50, %c0_51] : memref<16x8x128xf32, #tpu.memory_space<vmem>>, vector<1x8x128xf32>
    %107 = vector.shape_cast %106 : vector<1x8x128xf32> to vector<8x128xf32>
    %c10 = arith.constant 10 : index
    %c0_52 = arith.constant 0 : index
    %c0_53 = arith.constant 0 : index
    %108 = vector.load %arg3[%c10, %c0_52, %c0_53] : memref<37x8x128xf32, #tpu.memory_space<vmem>>, vector<1x8x128xf32>
    %109 = vector.shape_cast %108 : vector<1x8x128xf32> to vector<8x128xf32>
    %110 = vector.shape_cast %107 : vector<8x128xf32> to vector<1x8x128xf32>
    tpu.vector_store %arg3[%c10, %c0_52, %c0_53], %110 {strides = array<i32>} : memref<37x8x128xf32, #tpu.memory_space<vmem>>, vector<1x8x128xf32>,
    %c11_i32 = arith.constant 11 : i32
    %111 = arith.addi %0, %c11_i32 : i32
    %c36_i32_54 = arith.constant 36 : i32
    %112 = arith.minsi %111, %c36_i32_54 : i32
    %113 = arith.index_cast %112 : i32 to index
    %114 = memref.load %arg1[%113] : memref<37xi32, #tpu.memory_space<smem>>
    %115 = arith.index_cast %114 : i32 to index
    %c0_55 = arith.constant 0 : index
    %c0_56 = arith.constant 0 : index
    %116 = vector.load %arg2[%115, %c0_55, %c0_56] : memref<16x8x128xf32, #tpu.memory_space<vmem>>, vector<1x8x128xf32>
    %117 = vector.shape_cast %116 : vector<1x8x128xf32> to vector<8x128xf32>
    %c11 = arith.constant 11 : index
    %c0_57 = arith.constant 0 : index
    %c0_58 = arith.constant 0 : index
    %118 = vector.load %arg3[%c11, %c0_57, %c0_58] : memref<37x8x128xf32, #tpu.memory_space<vmem>>, vector<1x8x128xf32>
    %119 = vector.shape_cast %118 : vector<1x8x128xf32> to vector<8x128xf32>
    %120 = vector.shape_cast %117 : vector<8x128xf32> to vector<1x8x128xf32>
    tpu.vector_store %arg3[%c11, %c0_57, %c0_58], %120 {strides = array<i32>} : memref<37x8x128xf32, #tpu.memory_space<vmem>>, vector<1x8x128xf32>,
    %c12_i32 = arith.constant 12 : i32
    %121 = arith.addi %0, %c12_i32 : i32
    %c36_i32_59 = arith.constant 36 : i32
    %122 = arith.minsi %121, %c36_i32_59 : i32
    %123 = arith.index_cast %122 : i32 to index
    %124 = memref.load %arg1[%123] : memref<37xi32, #tpu.memory_space<smem>>
    %125 = arith.index_cast %124 : i32 to index
    %c0_60 = arith.constant 0 : index
    %c0_61 = arith.constant 0 : index
    %126 = vector.load %arg2[%125, %c0_60, %c0_61] : memref<16x8x128xf32, #tpu.memory_space<vmem>>, vector<1x8x128xf32>
    %127 = vector.shape_cast %126 : vector<1x8x128xf32> to vector<8x128xf32>
    %c12 = arith.constant 12 : index
    %c0_62 = arith.constant 0 : index
    %c0_63 = arith.constant 0 : index
    %128 = vector.load %arg3[%c12, %c0_62, %c0_63] : memref<37x8x128xf32, #tpu.memory_space<vmem>>, vector<1x8x128xf32>
    %129 = vector.shape_cast %128 : vector<1x8x128xf32> to vector<8x128xf32>
    %130 = vector.shape_cast %127 : vector<8x128xf32> to vector<1x8x128xf32>
    tpu.vector_store %arg3[%c12, %c0_62, %c0_63], %130 {strides = array<i32>} : memref<37x8x128xf32, #tpu.memory_space<vmem>>, vector<1x8x128xf32>,
    %c13_i32 = arith.constant 13 : i32
    %131 = arith.addi %0, %c13_i32 : i32
    %c36_i32_64 = arith.constant 36 : i32
    %132 = arith.minsi %131, %c36_i32_64 : i32
    %133 = arith.index_cast %132 : i32 to index
    %134 = memref.load %arg1[%133] : memref<37xi32, #tpu.memory_space<smem>>
    %135 = arith.index_cast %134 : i32 to index
    %c0_65 = arith.constant 0 : index
    %c0_66 = arith.constant 0 : index
    %136 = vector.load %arg2[%135, %c0_65, %c0_66] : memref<16x8x128xf32, #tpu.memory_space<vmem>>, vector<1x8x128xf32>
    %137 = vector.shape_cast %136 : vector<1x8x128xf32> to vector<8x128xf32>
    %c13 = arith.constant 13 : index
    %c0_67 = arith.constant 0 : index
    %c0_68 = arith.constant 0 : index
    %138 = vector.load %arg3[%c13, %c0_67, %c0_68] : memref<37x8x128xf32, #tpu.memory_space<vmem>>, vector<1x8x128xf32>
    %139 = vector.shape_cast %138 : vector<1x8x128xf32> to vector<8x128xf32>
    %140 = vector.shape_cast %137 : vector<8x128xf32> to vector<1x8x128xf32>
    tpu.vector_store %arg3[%c13, %c0_67, %c0_68], %140 {strides = array<i32>} : memref<37x8x128xf32, #tpu.memory_space<vmem>>, vector<1x8x128xf32>,
    %c14_i32 = arith.constant 14 : i32
    %141 = arith.addi %0, %c14_i32 : i32
    %c36_i32_69 = arith.constant 36 : i32
    %142 = arith.minsi %141, %c36_i32_69 : i32
    %143 = arith.index_cast %142 : i32 to index
    %144 = memref.load %arg1[%143] : memref<37xi32, #tpu.memory_space<smem>>
    %145 = arith.index_cast %144 : i32 to index
    %c0_70 = arith.constant 0 : index
    %c0_71 = arith.constant 0 : index
    %146 = vector.load %arg2[%145, %c0_70, %c0_71] : memref<16x8x128xf32, #tpu.memory_space<vmem>>, vector<1x8x128xf32>
    %147 = vector.shape_cast %146 : vector<1x8x128xf32> to vector<8x128xf32>
    %c14 = arith.constant 14 : index
    %c0_72 = arith.constant 0 : index
    %c0_73 = arith.constant 0 : index
    %148 = vector.load %arg3[%c14, %c0_72, %c0_73] : memref<37x8x128xf32, #tpu.memory_space<vmem>>, vector<1x8x128xf32>
    %149 = vector.shape_cast %148 : vector<1x8x128xf32> to vector<8x128xf32>
    %150 = vector.shape_cast %147 : vector<8x128xf32> to vector<1x8x128xf32>
    tpu.vector_store %arg3[%c14, %c0_72, %c0_73], %150 {strides = array<i32>} : memref<37x8x128xf32, #tpu.memory_space<vmem>>, vector<1x8x128xf32>,
    %c15_i32 = arith.constant 15 : i32
    %151 = arith.addi %0, %c15_i32 : i32
    %c36_i32_74 = arith.constant 36 : i32
    %152 = arith.minsi %151, %c36_i32_74 : i32
    %153 = arith.index_cast %152 : i32 to index
    %154 = memref.load %arg1[%153] : memref<37xi32, #tpu.memory_space<smem>>
    %155 = arith.index_cast %154 : i32 to index
    %c0_75 = arith.constant 0 : index
    %c0_76 = arith.constant 0 : index
    %156 = vector.load %arg2[%155, %c0_75, %c0_76] : memref<16x8x128xf32, #tpu.memory_space<vmem>>, vector<1x8x128xf32>
    %157 = vector.shape_cast %156 : vector<1x8x128xf32> to vector<8x128xf32>
    %c15 = arith.constant 15 : index
    %c0_77 = arith.constant 0 : index
    %c0_78 = arith.constant 0 : index
    %158 = vector.load %arg3[%c15, %c0_77, %c0_78] : memref<37x8x128xf32, #tpu.memory_space<vmem>>, vector<1x8x128xf32>
    %159 = vector.shape_cast %158 : vector<1x8x128xf32> to vector<8x128xf32>
    %160 = vector.shape_cast %157 : vector<8x128xf32> to vector<1x8x128xf32>
    tpu.vector_store %arg3[%c15, %c0_77, %c0_78], %160 {strides = array<i32>} : memref<37x8x128xf32, #tpu.memory_space<vmem>>, vector<1x8x128xf32>,
    %c16_i32 = arith.constant 16 : i32
    %161 = arith.addi %0, %c16_i32 : i32
    %c36_i32_79 = arith.constant 36 : i32
    %162 = arith.minsi %161, %c36_i32_79 : i32
    %163 = arith.index_cast %162 : i32 to index
    %164 = memref.load %arg1[%163] : memref<37xi32, #tpu.memory_space<smem>>
    %165 = arith.index_cast %164 : i32 to index
    %c0_80 = arith.constant 0 : index
    %c0_81 = arith.constant 0 : index
    %166 = vector.load %arg2[%165, %c0_80, %c0_81] : memref<16x8x128xf32, #tpu.memory_space<vmem>>, vector<1x8x128xf32>
    %167 = vector.shape_cast %166 : vector<1x8x128xf32> to vector<8x128xf32>
    %c16 = arith.constant 16 : index
    %c0_82 = arith.constant 0 : index
    %c0_83 = arith.constant 0 : index
    %168 = vector.load %arg3[%c16, %c0_82, %c0_83] : memref<37x8x128xf32, #tpu.memory_space<vmem>>, vector<1x8x128xf32>
    %169 = vector.shape_cast %168 : vector<1x8x128xf32> to vector<8x128xf32>
    %170 = vector.shape_cast %167 : vector<8x128xf32> to vector<1x8x128xf32>
    tpu.vector_store %arg3[%c16, %c0_82, %c0_83], %170 {strides = array<i32>} : memref<37x8x128xf32, #tpu.memory_space<vmem>>, vector<1x8x128xf32>,
    %c17_i32 = arith.constant 17 : i32
    %171 = arith.addi %0, %c17_i32 : i32
    %c36_i32_84 = arith.constant 36 : i32
    %172 = arith.minsi %171, %c36_i32_84 : i32
    %173 = arith.index_cast %172 : i32 to index
    %174 = memref.load %arg1[%173] : memref<37xi32, #tpu.memory_space<smem>>
    %175 = arith.index_cast %174 : i32 to index
    %c0_85 = arith.constant 0 : index
    %c0_86 = arith.constant 0 : index
    %176 = vector.load %arg2[%175, %c0_85, %c0_86] : memref<16x8x128xf32, #tpu.memory_space<vmem>>, vector<1x8x128xf32>
    %177 = vector.shape_cast %176 : vector<1x8x128xf32> to vector<8x128xf32>
    %c17 = arith.constant 17 : index
    %c0_87 = arith.constant 0 : index
    %c0_88 = arith.constant 0 : index
    %178 = vector.load %arg3[%c17, %c0_87, %c0_88] : memref<37x8x128xf32, #tpu.memory_space<vmem>>, vector<1x8x128xf32>
    %179 = vector.shape_cast %178 : vector<1x8x128xf32> to vector<8x128xf32>
    %180 = vector.shape_cast %177 : vector<8x128xf32> to vector<1x8x128xf32>
    tpu.vector_store %arg3[%c17, %c0_87, %c0_88], %180 {strides = array<i32>} : memref<37x8x128xf32, #tpu.memory_space<vmem>>, vector<1x8x128xf32>,
    %c18_i32 = arith.constant 18 : i32
    %181 = arith.addi %0, %c18_i32 : i32
    %c36_i32_89 = arith.constant 36 : i32
    %182 = arith.minsi %181, %c36_i32_89 : i32
    %183 = arith.index_cast %182 : i32 to index
    %184 = memref.load %arg1[%183] : memref<37xi32, #tpu.memory_space<smem>>
    %185 = arith.index_cast %184 : i32 to index
    %c0_90 = arith.constant 0 : index
    %c0_91 = arith.constant 0 : index
    %186 = vector.load %arg2[%185, %c0_90, %c0_91] : memref<16x8x128xf32, #tpu.memory_space<vmem>>, vector<1x8x128xf32>
    %187 = vector.shape_cast %186 : vector<1x8x128xf32> to vector<8x128xf32>
    %c18 = arith.constant 18 : index
    %c0_92 = arith.constant 0 : index
    %c0_93 = arith.constant 0 : index
    %188 = vector.load %arg3[%c18, %c0_92, %c0_93] : memref<37x8x128xf32, #tpu.memory_space<vmem>>, vector<1x8x128xf32>
    %189 = vector.shape_cast %188 : vector<1x8x128xf32> to vector<8x128xf32>
    %190 = vector.shape_cast %187 : vector<8x128xf32> to vector<1x8x128xf32>
    tpu.vector_store %arg3[%c18, %c0_92, %c0_93], %190 {strides = array<i32>} : memref<37x8x128xf32, #tpu.memory_space<vmem>>, vector<1x8x128xf32>,
    %c19_i32 = arith.constant 19 : i32
    %191 = arith.addi %0, %c19_i32 : i32
    %c36_i32_94 = arith.constant 36 : i32
    %192 = arith.minsi %191, %c36_i32_94 : i32
    %193 = arith.index_cast %192 : i32 to index
    %194 = memref.load %arg1[%193] : memref<37xi32, #tpu.memory_space<smem>>
    %195 = arith.index_cast %194 : i32 to index
    %c0_95 = arith.constant 0 : index
    %c0_96 = arith.constant 0 : index
    %196 = vector.load %arg2[%195, %c0_95, %c0_96] : memref<16x8x128xf32, #tpu.memory_space<vmem>>, vector<1x8x128xf32>
    %197 = vector.shape_cast %196 : vector<1x8x128xf32> to vector<8x128xf32>
    %c19 = arith.constant 19 : index
    %c0_97 = arith.constant 0 : index
    %c0_98 = arith.constant 0 : index
    %198 = vector.load %arg3[%c19, %c0_97, %c0_98] : memref<37x8x128xf32, #tpu.memory_space<vmem>>, vector<1x8x128xf32>
    %199 = vector.shape_cast %198 : vector<1x8x128xf32> to vector<8x128xf32>
    %200 = vector.shape_cast %197 : vector<8x128xf32> to vector<1x8x128xf32>
    tpu.vector_store %arg3[%c19, %c0_97, %c0_98], %200 {strides = array<i32>} : memref<37x8x128xf32, #tpu.memory_space<vmem>>, vector<1x8x128xf32>,
    %c20_i32 = arith.constant 20 : i32
    %201 = arith.addi %0, %c20_i32 : i32
    %c36_i32_99 = arith.constant 36 : i32
    %202 = arith.minsi %201, %c36_i32_99 : i32
    %203 = arith.index_cast %202 : i32 to index
    %204 = memref.load %arg1[%203] : memref<37xi32, #tpu.memory_space<smem>>
    %205 = arith.index_cast %204 : i32 to index
    %c0_100 = arith.constant 0 : index
    %c0_101 = arith.constant 0 : index
    %206 = vector.load %arg2[%205, %c0_100, %c0_101] : memref<16x8x128xf32, #tpu.memory_space<vmem>>, vector<1x8x128xf32>
    %207 = vector.shape_cast %206 : vector<1x8x128xf32> to vector<8x128xf32>
    %c20 = arith.constant 20 : index
    %c0_102 = arith.constant 0 : index
    %c0_103 = arith.constant 0 : index
    %208 = vector.load %arg3[%c20, %c0_102, %c0_103] : memref<37x8x128xf32, #tpu.memory_space<vmem>>, vector<1x8x128xf32>
    %209 = vector.shape_cast %208 : vector<1x8x128xf32> to vector<8x128xf32>
    %210 = vector.shape_cast %207 : vector<8x128xf32> to vector<1x8x128xf32>
    tpu.vector_store %arg3[%c20, %c0_102, %c0_103], %210 {strides = array<i32>} : memref<37x8x128xf32, #tpu.memory_space<vmem>>, vector<1x8x128xf32>,
    %c21_i32 = arith.constant 21 : i32
    %211 = arith.addi %0, %c21_i32 : i32
    %c36_i32_104 = arith.constant 36 : i32
    %212 = arith.minsi %211, %c36_i32_104 : i32
    %213 = arith.index_cast %212 : i32 to index
    %214 = memref.load %arg1[%213] : memref<37xi32, #tpu.memory_space<smem>>
    %215 = arith.index_cast %214 : i32 to index
    %c0_105 = arith.constant 0 : index
    %c0_106 = arith.constant 0 : index
    %216 = vector.load %arg2[%215, %c0_105, %c0_106] : memref<16x8x128xf32, #tpu.memory_space<vmem>>, vector<1x8x128xf32>
    %217 = vector.shape_cast %216 : vector<1x8x128xf32> to vector<8x128xf32>
    %c21 = arith.constant 21 : index
    %c0_107 = arith.constant 0 : index
    %c0_108 = arith.constant 0 : index
    %218 = vector.load %arg3[%c21, %c0_107, %c0_108] : memref<37x8x128xf32, #tpu.memory_space<vmem>>, vector<1x8x128xf32>
    %219 = vector.shape_cast %218 : vector<1x8x128xf32> to vector<8x128xf32>
    %220 = vector.shape_cast %217 : vector<8x128xf32> to vector<1x8x128xf32>
    tpu.vector_store %arg3[%c21, %c0_107, %c0_108], %220 {strides = array<i32>} : memref<37x8x128xf32, #tpu.memory_space<vmem>>, vector<1x8x128xf32>,
    %c22_i32 = arith.constant 22 : i32
    %221 = arith.addi %0, %c22_i32 : i32
    %c36_i32_109 = arith.constant 36 : i32
    %222 = arith.minsi %221, %c36_i32_109 : i32
    %223 = arith.index_cast %222 : i32 to index
    %224 = memref.load %arg1[%223] : memref<37xi32, #tpu.memory_space<smem>>
    %225 = arith.index_cast %224 : i32 to index
    %c0_110 = arith.constant 0 : index
    %c0_111 = arith.constant 0 : index
    %226 = vector.load %arg2[%225, %c0_110, %c0_111] : memref<16x8x128xf32, #tpu.memory_space<vmem>>, vector<1x8x128xf32>
    %227 = vector.shape_cast %226 : vector<1x8x128xf32> to vector<8x128xf32>
    %c22 = arith.constant 22 : index
    %c0_112 = arith.constant 0 : index
    %c0_113 = arith.constant 0 : index
    %228 = vector.load %arg3[%c22, %c0_112, %c0_113] : memref<37x8x128xf32, #tpu.memory_space<vmem>>, vector<1x8x128xf32>
    %229 = vector.shape_cast %228 : vector<1x8x128xf32> to vector<8x128xf32>
    %230 = vector.shape_cast %227 : vector<8x128xf32> to vector<1x8x128xf32>
    tpu.vector_store %arg3[%c22, %c0_112, %c0_113], %230 {strides = array<i32>} : memref<37x8x128xf32, #tpu.memory_space<vmem>>, vector<1x8x128xf32>,
    %c23_i32 = arith.constant 23 : i32
    %231 = arith.addi %0, %c23_i32 : i32
    %c36_i32_114 = arith.constant 36 : i32
    %232 = arith.minsi %231, %c36_i32_114 : i32
    %233 = arith.index_cast %232 : i32 to index
    %234 = memref.load %arg1[%233] : memref<37xi32, #tpu.memory_space<smem>>
    %235 = arith.index_cast %234 : i32 to index
    %c0_115 = arith.constant 0 : index
    %c0_116 = arith.constant 0 : index
    %236 = vector.load %arg2[%235, %c0_115, %c0_116] : memref<16x8x128xf32, #tpu.memory_space<vmem>>, vector<1x8x128xf32>
    %237 = vector.shape_cast %236 : vector<1x8x128xf32> to vector<8x128xf32>
    %c23 = arith.constant 23 : index
    %c0_117 = arith.constant 0 : index
    %c0_118 = arith.constant 0 : index
    %238 = vector.load %arg3[%c23, %c0_117, %c0_118] : memref<37x8x128xf32, #tpu.memory_space<vmem>>, vector<1x8x128xf32>
    %239 = vector.shape_cast %238 : vector<1x8x128xf32> to vector<8x128xf32>
    %240 = vector.shape_cast %237 : vector<8x128xf32> to vector<1x8x128xf32>
    tpu.vector_store %arg3[%c23, %c0_117, %c0_118], %240 {strides = array<i32>} : memref<37x8x128xf32, #tpu.memory_space<vmem>>, vector<1x8x128xf32>,
    %c24_i32 = arith.constant 24 : i32
    %241 = arith.addi %0, %c24_i32 : i32
    %c36_i32_119 = arith.constant 36 : i32
    %242 = arith.minsi %241, %c36_i32_119 : i32
    %243 = arith.index_cast %242 : i32 to index
    %244 = memref.load %arg1[%243] : memref<37xi32, #tpu.memory_space<smem>>
    %245 = arith.index_cast %244 : i32 to index
    %c0_120 = arith.constant 0 : index
    %c0_121 = arith.constant 0 : index
    %246 = vector.load %arg2[%245, %c0_120, %c0_121] : memref<16x8x128xf32, #tpu.memory_space<vmem>>, vector<1x8x128xf32>
    %247 = vector.shape_cast %246 : vector<1x8x128xf32> to vector<8x128xf32>
    %c24 = arith.constant 24 : index
    %c0_122 = arith.constant 0 : index
    %c0_123 = arith.constant 0 : index
    %248 = vector.load %arg3[%c24, %c0_122, %c0_123] : memref<37x8x128xf32, #tpu.memory_space<vmem>>, vector<1x8x128xf32>
    %249 = vector.shape_cast %248 : vector<1x8x128xf32> to vector<8x128xf32>
    %250 = vector.shape_cast %247 : vector<8x128xf32> to vector<1x8x128xf32>
    tpu.vector_store %arg3[%c24, %c0_122, %c0_123], %250 {strides = array<i32>} : memref<37x8x128xf32, #tpu.memory_space<vmem>>, vector<1x8x128xf32>,
    %c25_i32 = arith.constant 25 : i32
    %251 = arith.addi %0, %c25_i32 : i32
    %c36_i32_124 = arith.constant 36 : i32
    %252 = arith.minsi %251, %c36_i32_124 : i32
    %253 = arith.index_cast %252 : i32 to index
    %254 = memref.load %arg1[%253] : memref<37xi32, #tpu.memory_space<smem>>
    %255 = arith.index_cast %254 : i32 to index
    %c0_125 = arith.constant 0 : index
    %c0_126 = arith.constant 0 : index
    %256 = vector.load %arg2[%255, %c0_125, %c0_126] : memref<16x8x128xf32, #tpu.memory_space<vmem>>, vector<1x8x128xf32>
    %257 = vector.shape_cast %256 : vector<1x8x128xf32> to vector<8x128xf32>
    %c25 = arith.constant 25 : index
    %c0_127 = arith.constant 0 : index
    %c0_128 = arith.constant 0 : index
    %258 = vector.load %arg3[%c25, %c0_127, %c0_128] : memref<37x8x128xf32, #tpu.memory_space<vmem>>, vector<1x8x128xf32>
    %259 = vector.shape_cast %258 : vector<1x8x128xf32> to vector<8x128xf32>
    %260 = vector.shape_cast %257 : vector<8x128xf32> to vector<1x8x128xf32>
    tpu.vector_store %arg3[%c25, %c0_127, %c0_128], %260 {strides = array<i32>} : memref<37x8x128xf32, #tpu.memory_space<vmem>>, vector<1x8x128xf32>,
    %c26_i32 = arith.constant 26 : i32
    %261 = arith.addi %0, %c26_i32 : i32
    %c36_i32_129 = arith.constant 36 : i32
    %262 = arith.minsi %261, %c36_i32_129 : i32
    %263 = arith.index_cast %262 : i32 to index
    %264 = memref.load %arg1[%263] : memref<37xi32, #tpu.memory_space<smem>>
    %265 = arith.index_cast %264 : i32 to index
    %c0_130 = arith.constant 0 : index
    %c0_131 = arith.constant 0 : index
    %266 = vector.load %arg2[%265, %c0_130, %c0_131] : memref<16x8x128xf32, #tpu.memory_space<vmem>>, vector<1x8x128xf32>
    %267 = vector.shape_cast %266 : vector<1x8x128xf32> to vector<8x128xf32>
    %c26 = arith.constant 26 : index
    %c0_132 = arith.constant 0 : index
    %c0_133 = arith.constant 0 : index
    %268 = vector.load %arg3[%c26, %c0_132, %c0_133] : memref<37x8x128xf32, #tpu.memory_space<vmem>>, vector<1x8x128xf32>
    %269 = vector.shape_cast %268 : vector<1x8x128xf32> to vector<8x128xf32>
    %270 = vector.shape_cast %267 : vector<8x128xf32> to vector<1x8x128xf32>
    tpu.vector_store %arg3[%c26, %c0_132, %c0_133], %270 {strides = array<i32>} : memref<37x8x128xf32, #tpu.memory_space<vmem>>, vector<1x8x128xf32>,
    %c27_i32 = arith.constant 27 : i32
    %271 = arith.addi %0, %c27_i32 : i32
    %c36_i32_134 = arith.constant 36 : i32
    %272 = arith.minsi %271, %c36_i32_134 : i32
    %273 = arith.index_cast %272 : i32 to index
    %274 = memref.load %arg1[%273] : memref<37xi32, #tpu.memory_space<smem>>
    %275 = arith.index_cast %274 : i32 to index
    %c0_135 = arith.constant 0 : index
    %c0_136 = arith.constant 0 : index
    %276 = vector.load %arg2[%275, %c0_135, %c0_136] : memref<16x8x128xf32, #tpu.memory_space<vmem>>, vector<1x8x128xf32>
    %277 = vector.shape_cast %276 : vector<1x8x128xf32> to vector<8x128xf32>
    %c27 = arith.constant 27 : index
    %c0_137 = arith.constant 0 : index
    %c0_138 = arith.constant 0 : index
    %278 = vector.load %arg3[%c27, %c0_137, %c0_138] : memref<37x8x128xf32, #tpu.memory_space<vmem>>, vector<1x8x128xf32>
    %279 = vector.shape_cast %278 : vector<1x8x128xf32> to vector<8x128xf32>
    %280 = vector.shape_cast %277 : vector<8x128xf32> to vector<1x8x128xf32>
    tpu.vector_store %arg3[%c27, %c0_137, %c0_138], %280 {strides = array<i32>} : memref<37x8x128xf32, #tpu.memory_space<vmem>>, vector<1x8x128xf32>,
    %c28_i32 = arith.constant 28 : i32
    %281 = arith.addi %0, %c28_i32 : i32
    %c36_i32_139 = arith.constant 36 : i32
    %282 = arith.minsi %281, %c36_i32_139 : i32
    %283 = arith.index_cast %282 : i32 to index
    %284 = memref.load %arg1[%283] : memref<37xi32, #tpu.memory_space<smem>>
    %285 = arith.index_cast %284 : i32 to index
    %c0_140 = arith.constant 0 : index
    %c0_141 = arith.constant 0 : index
    %286 = vector.load %arg2[%285, %c0_140, %c0_141] : memref<16x8x128xf32, #tpu.memory_space<vmem>>, vector<1x8x128xf32>
    %287 = vector.shape_cast %286 : vector<1x8x128xf32> to vector<8x128xf32>
    %c28 = arith.constant 28 : index
    %c0_142 = arith.constant 0 : index
    %c0_143 = arith.constant 0 : index
    %288 = vector.load %arg3[%c28, %c0_142, %c0_143] : memref<37x8x128xf32, #tpu.memory_space<vmem>>, vector<1x8x128xf32>
    %289 = vector.shape_cast %288 : vector<1x8x128xf32> to vector<8x128xf32>
    %290 = vector.shape_cast %287 : vector<8x128xf32> to vector<1x8x128xf32>
    tpu.vector_store %arg3[%c28, %c0_142, %c0_143], %290 {strides = array<i32>} : memref<37x8x128xf32, #tpu.memory_space<vmem>>, vector<1x8x128xf32>,
    %c29_i32 = arith.constant 29 : i32
    %291 = arith.addi %0, %c29_i32 : i32
    %c36_i32_144 = arith.constant 36 : i32
    %292 = arith.minsi %291, %c36_i32_144 : i32
    %293 = arith.index_cast %292 : i32 to index
    %294 = memref.load %arg1[%293] : memref<37xi32, #tpu.memory_space<smem>>
    %295 = arith.index_cast %294 : i32 to index
    %c0_145 = arith.constant 0 : index
    %c0_146 = arith.constant 0 : index
    %296 = vector.load %arg2[%295, %c0_145, %c0_146] : memref<16x8x128xf32, #tpu.memory_space<vmem>>, vector<1x8x128xf32>
    %297 = vector.shape_cast %296 : vector<1x8x128xf32> to vector<8x128xf32>
    %c29 = arith.constant 29 : index
    %c0_147 = arith.constant 0 : index
    %c0_148 = arith.constant 0 : index
    %298 = vector.load %arg3[%c29, %c0_147, %c0_148] : memref<37x8x128xf32, #tpu.memory_space<vmem>>, vector<1x8x128xf32>
    %299 = vector.shape_cast %298 : vector<1x8x128xf32> to vector<8x128xf32>
    %300 = vector.shape_cast %297 : vector<8x128xf32> to vector<1x8x128xf32>
    tpu.vector_store %arg3[%c29, %c0_147, %c0_148], %300 {strides = array<i32>} : memref<37x8x128xf32, #tpu.memory_space<vmem>>, vector<1x8x128xf32>,
    %c30_i32 = arith.constant 30 : i32
    %301 = arith.addi %0, %c30_i32 : i32
    %c36_i32_149 = arith.constant 36 : i32
    %302 = arith.minsi %301, %c36_i32_149 : i32
    %303 = arith.index_cast %302 : i32 to index
    %304 = memref.load %arg1[%303] : memref<37xi32, #tpu.memory_space<smem>>
    %305 = arith.index_cast %304 : i32 to index
    %c0_150 = arith.constant 0 : index
    %c0_151 = arith.constant 0 : index
    %306 = vector.load %arg2[%305, %c0_150, %c0_151] : memref<16x8x128xf32, #tpu.memory_space<vmem>>, vector<1x8x128xf32>
    %307 = vector.shape_cast %306 : vector<1x8x128xf32> to vector<8x128xf32>
    %c30 = arith.constant 30 : index
    %c0_152 = arith.constant 0 : index
    %c0_153 = arith.constant 0 : index
    %308 = vector.load %arg3[%c30, %c0_152, %c0_153] : memref<37x8x128xf32, #tpu.memory_space<vmem>>, vector<1x8x128xf32>
    %309 = vector.shape_cast %308 : vector<1x8x128xf32> to vector<8x128xf32>
    %310 = vector.shape_cast %307 : vector<8x128xf32> to vector<1x8x128xf32>
    tpu.vector_store %arg3[%c30, %c0_152, %c0_153], %310 {strides = array<i32>} : memref<37x8x128xf32, #tpu.memory_space<vmem>>, vector<1x8x128xf32>,
    %c31_i32 = arith.constant 31 : i32
    %311 = arith.addi %0, %c31_i32 : i32
    %c36_i32_154 = arith.constant 36 : i32
    %312 = arith.minsi %311, %c36_i32_154 : i32
    %313 = arith.index_cast %312 : i32 to index
    %314 = memref.load %arg1[%313] : memref<37xi32, #tpu.memory_space<smem>>
    %315 = arith.index_cast %314 : i32 to index
    %c0_155 = arith.constant 0 : index
    %c0_156 = arith.constant 0 : index
    %316 = vector.load %arg2[%315, %c0_155, %c0_156] : memref<16x8x128xf32, #tpu.memory_space<vmem>>, vector<1x8x128xf32>
    %317 = vector.shape_cast %316 : vector<1x8x128xf32> to vector<8x128xf32>
    %c31 = arith.constant 31 : index
    %c0_157 = arith.constant 0 : index
    %c0_158 = arith.constant 0 : index
    %318 = vector.load %arg3[%c31, %c0_157, %c0_158] : memref<37x8x128xf32, #tpu.memory_space<vmem>>, vector<1x8x128xf32>
    %319 = vector.shape_cast %318 : vector<1x8x128xf32> to vector<8x128xf32>
    %320 = vector.shape_cast %317 : vector<8x128xf32> to vector<1x8x128xf32>
    tpu.vector_store %arg3[%c31, %c0_157, %c0_158], %320 {strides = array<i32>} : memref<37x8x128xf32, #tpu.memory_space<vmem>>, vector<1x8x128xf32>,
    %c32_i32 = arith.constant 32 : i32
    %321 = arith.addi %0, %c32_i32 : i32
    %c36_i32_159 = arith.constant 36 : i32
    %322 = arith.minsi %321, %c36_i32_159 : i32
    %323 = arith.index_cast %322 : i32 to index
    %324 = memref.load %arg1[%323] : memref<37xi32, #tpu.memory_space<smem>>
    %325 = arith.index_cast %324 : i32 to index
    %c0_160 = arith.constant 0 : index
    %c0_161 = arith.constant 0 : index
    %326 = vector.load %arg2[%325, %c0_160, %c0_161] : memref<16x8x128xf32, #tpu.memory_space<vmem>>, vector<1x8x128xf32>
    %327 = vector.shape_cast %326 : vector<1x8x128xf32> to vector<8x128xf32>
    %c32 = arith.constant 32 : index
    %c0_162 = arith.constant 0 : index
    %c0_163 = arith.constant 0 : index
    %328 = vector.load %arg3[%c32, %c0_162, %c0_163] : memref<37x8x128xf32, #tpu.memory_space<vmem>>, vector<1x8x128xf32>
    %329 = vector.shape_cast %328 : vector<1x8x128xf32> to vector<8x128xf32>
    %330 = vector.shape_cast %327 : vector<8x128xf32> to vector<1x8x128xf32>
    tpu.vector_store %arg3[%c32, %c0_162, %c0_163], %330 {strides = array<i32>} : memref<37x8x128xf32, #tpu.memory_space<vmem>>, vector<1x8x128xf32>,
    %c33_i32 = arith.constant 33 : i32
    %331 = arith.addi %0, %c33_i32 : i32
    %c36_i32_164 = arith.constant 36 : i32
    %332 = arith.minsi %331, %c36_i32_164 : i32
    %333 = arith.index_cast %332 : i32 to index
    %334 = memref.load %arg1[%333] : memref<37xi32, #tpu.memory_space<smem>>
    %335 = arith.index_cast %334 : i32 to index
    %c0_165 = arith.constant 0 : index
    %c0_166 = arith.constant 0 : index
    %336 = vector.load %arg2[%335, %c0_165, %c0_166] : memref<16x8x128xf32, #tpu.memory_space<vmem>>, vector<1x8x128xf32>
    %337 = vector.shape_cast %336 : vector<1x8x128xf32> to vector<8x128xf32>
    %c33 = arith.constant 33 : index
    %c0_167 = arith.constant 0 : index
    %c0_168 = arith.constant 0 : index
    %338 = vector.load %arg3[%c33, %c0_167, %c0_168] : memref<37x8x128xf32, #tpu.memory_space<vmem>>, vector<1x8x128xf32>
    %339 = vector.shape_cast %338 : vector<1x8x128xf32> to vector<8x128xf32>
    %340 = vector.shape_cast %337 : vector<8x128xf32> to vector<1x8x128xf32>
    tpu.vector_store %arg3[%c33, %c0_167, %c0_168], %340 {strides = array<i32>} : memref<37x8x128xf32, #tpu.memory_space<vmem>>, vector<1x8x128xf32>,
    %c34_i32 = arith.constant 34 : i32
    %341 = arith.addi %0, %c34_i32 : i32
    %c36_i32_169 = arith.constant 36 : i32
    %342 = arith.minsi %341, %c36_i32_169 : i32
    %343 = arith.index_cast %342 : i32 to index
    %344 = memref.load %arg1[%343] : memref<37xi32, #tpu.memory_space<smem>>
    %345 = arith.index_cast %344 : i32 to index
    %c0_170 = arith.constant 0 : index
    %c0_171 = arith.constant 0 : index
    %346 = vector.load %arg2[%345, %c0_170, %c0_171] : memref<16x8x128xf32, #tpu.memory_space<vmem>>, vector<1x8x128xf32>
    %347 = vector.shape_cast %346 : vector<1x8x128xf32> to vector<8x128xf32>
    %c34 = arith.constant 34 : index
    %c0_172 = arith.constant 0 : index
    %c0_173 = arith.constant 0 : index
    %348 = vector.load %arg3[%c34, %c0_172, %c0_173] : memref<37x8x128xf32, #tpu.memory_space<vmem>>, vector<1x8x128xf32>
    %349 = vector.shape_cast %348 : vector<1x8x128xf32> to vector<8x128xf32>
    %350 = vector.shape_cast %347 : vector<8x128xf32> to vector<1x8x128xf32>
    tpu.vector_store %arg3[%c34, %c0_172, %c0_173], %350 {strides = array<i32>} : memref<37x8x128xf32, #tpu.memory_space<vmem>>, vector<1x8x128xf32>,
    %c35_i32 = arith.constant 35 : i32
    %351 = arith.addi %0, %c35_i32 : i32
    %c36_i32_174 = arith.constant 36 : i32
    %352 = arith.minsi %351, %c36_i32_174 : i32
    %353 = arith.index_cast %352 : i32 to index
    %354 = memref.load %arg1[%353] : memref<37xi32, #tpu.memory_space<smem>>
    %355 = arith.index_cast %354 : i32 to index
    %c0_175 = arith.constant 0 : index
    %c0_176 = arith.constant 0 : index
    %356 = vector.load %arg2[%355, %c0_175, %c0_176] : memref<16x8x128xf32, #tpu.memory_space<vmem>>, vector<1x8x128xf32>
    %357 = vector.shape_cast %356 : vector<1x8x128xf32> to vector<8x128xf32>
    %c35 = arith.constant 35 : index
    %c0_177 = arith.constant 0 : index
    %c0_178 = arith.constant 0 : index
    %358 = vector.load %arg3[%c35, %c0_177, %c0_178] : memref<37x8x128xf32, #tpu.memory_space<vmem>>, vector<1x8x128xf32>
    %359 = vector.shape_cast %358 : vector<1x8x128xf32> to vector<8x128xf32>
    %360 = vector.shape_cast %357 : vector<8x128xf32> to vector<1x8x128xf32>
    tpu.vector_store %arg3[%c35, %c0_177, %c0_178], %360 {strides = array<i32>} : memref<37x8x128xf32, #tpu.memory_space<vmem>>, vector<1x8x128xf32>,
    %c36_i32_179 = arith.constant 36 : i32
    %361 = arith.addi %0, %c36_i32_179 : i32
    %c36_i32_180 = arith.constant 36 : i32
    %362 = arith.minsi %361, %c36_i32_180 : i32
    %363 = arith.index_cast %362 : i32 to index
    %364 = memref.load %arg1[%363] : memref<37xi32, #tpu.memory_space<smem>>
    %365 = arith.index_cast %364 : i32 to index
    %c0_181 = arith.constant 0 : index
    %c0_182 = arith.constant 0 : index
    %366 = vector.load %arg2[%365, %c0_181, %c0_182] : memref<16x8x128xf32, #tpu.memory_space<vmem>>, vector<1x8x128xf32>
    %367 = vector.shape_cast %366 : vector<1x8x128xf32> to vector<8x128xf32>
    %c36 = arith.constant 36 : index
    %c0_183 = arith.constant 0 : index
    %c0_184 = arith.constant 0 : index
    %368 = vector.load %arg3[%c36, %c0_183, %c0_184] : memref<37x8x128xf32, #tpu.memory_space<vmem>>, vector<1x8x128xf32>
    %369 = vector.shape_cast %368 : vector<1x8x128xf32> to vector<8x128xf32>
    %370 = vector.shape_cast %367 : vector<8x128xf32> to vector<1x8x128xf32>
    tpu.vector_store %arg3[%c36, %c0_183, %c0_184], %370 {strides = array<i32>} : memref<37x8x128xf32, #tpu.memory_space<vmem>>, vector<1x8x128xf32>,
    return
  }
  func.func @transform_0(%arg0: i32, %arg1: memref<37xi32, #tpu.memory_space<smem>>) -> (i32, i32, i32) {
    %c0_i32 = arith.constant 0 : i32
    %c0_i32_0 = arith.constant 0 : i32
    %c0_i32_1 = arith.constant 0 : i32
    %c0_i32_2 = arith.constant 0 : i32
    return %c0_i32, %c0_i32_0, %c0_i32_1 : i32, i32, i32
  }
  func.func @transform_1(%arg0: i32, %arg1: memref<37xi32, #tpu.memory_space<smem>>) -> (i32, i32, i32) {
    %c0_i32 = arith.constant 0 : i32
    %c0_i32_0 = arith.constant 0 : i32
    %c0_i32_1 = arith.constant 0 : i32
    return %arg0, %c0_i32, %c0_i32_0 : i32, i32, i32
  }
}

</mosaic_0001>

<bundles_post_ra>
// kernel: tpu_custom_call.1
= control target key start
LH: loop header
LB: loop body
LE: loop exit
PB: predicated region body
PF: predicated region fallthrough
CT: control target
= control target key end

     0   :  { %s583_s9 = smov [#allocation3]   ;;  %s618_s0 = inlined_call_operand.hbm [shape: s32[37], index: 0, kind: input, shape index: {}]   ;;  %s619_s1 = inlined_call_operand.hbm [shape: f32[16,8,128], index: 1, kind: input, shape index: {}]   ;;  %s620_s2 = inlined_call_operand.hbm [shape: f32[37,8,128], index: 2, kind: output, shape index: {}]  }
   0x1   :  { %8 = dma.hbm_to_smem %s618_s0, 16, %s583_s9, [#allocation2] }
   0x2   :  { %577 = dma.done.wait [#allocation2], 16 }
   0x3   :  { %578 = vsyncadd [#allocation2], 4294967280 }
   0x4   :  { %10 = sfence }
   0x5   :  { %11 = vsyncpa [#allocation5], 0 }
   0x6   :  { %12 = vsyncpa [#allocation6], 0  ;;  %s584_s12 = smov [#allocation4]  }
   0x7   :  { %s18_s13 = sshll.u32 %s584_s12, 4  ;;  %s19_s13 = int_to_ptr.vmem [resolvable:$true] %s18_s13 }
   0x8   :  { %s545_s14 = scalar_lea.vmem %s19_s13, 2048  ;;  %p550_p1 = scmp.lt.s32.totalorder %s19_s13, %s19_s13 }
   0x9   :  { %p546_p0 = scmp.ne.s32.totalorder %s19_s13, %s545_s14  ;;  %p551_p2 = scmp.lt.s32.totalorder %s545_s14, %s545_s14 }
   0xb   :  { %p552_p3 = por %p551_p2, %p550_p1 }
   0xd   :  { %p553_p4 = pnand %p552_p3, %p546_p0 }
   0xf   :  { %556 = shalt.err (!%p553_p4)
}
  0x10   :  { %s585_s15 = smov 128   ;;  %s586_s16 = smov 8  }
  0x11   :  { %24 = dma.hbm_to_vmem [thread:$0]  %s619_s1, 2048, %s19_s13, [#allocation5], %s585_s15, %s585_s15, %s586_s16  }
  0x12   :  { %579 = dma.done.wait [#allocation5], 2048  }
  0x13   :  { %580 = vsyncadd [#allocation5], 4294965248  ;;  %s31_s18 = sld [smem:[#allocation3]] }
  0x14   :  { %s452_s19 = sld [smem:[#allocation3 + $0x1]] }
  0x15   :  { %s454_s20 = sld [smem:[#allocation3 + $0x2]] }
  0x16   :  { %s456_s21 = sld [smem:[#allocation3 + $0x3]] }
  0x17   :  { %s458_s22 = sld [smem:[#allocation3 + $0x4]] }
  0x18   :  { %s460_s23 = sld [smem:[#allocation3 + $0x5]] }
  0x19   :  { %s451_s24 = sshll.u32 %s31_s18, 3  ;;  %s462_s25 = sld [smem:[#allocation3 + $0x6]] }
  0x1a   :  { %s453_s26 = sshll.u32 %s452_s19, 3  ;;  %s33_s27 = scalar_lea.vmem [#allocation4], %s451_s24 }
  0x1b   :  { %v34_v0 = vld [vmem:[%s33_s27] sm:$0xff]  ;;  %s455_s28 = sshll.u32 %s454_s20, 3  ;;  %s41_s29 = scalar_lea.vmem [#allocation4], %s453_s26 }
  0x1c   :  { %35 = vst [vmem:[#allocation7] sm:$0xff] %v34_v0  ;;  %v42_v1 = vld [vmem:[%s41_s29] sm:$0xff]  ;;  %s457_s30 = sshll.u32 %s456_s21, 3  ;;  %s50_s1 = scalar_lea.vmem [#allocation4], %s455_s28 }
  0x1d   :  { %44 = vst [vmem:[#allocation7 + $0x8] sm:$0xff] %v42_v1  ;;  %v51_v2 = vld [vmem:[%s50_s1] sm:$0xff]  ;;  %s459_s3 = sshll.u32 %s458_s22, 3  ;;  %s59_s4 = scalar_lea.vmem [#allocation4], %s457_s30 }
  0x1e   :  { %53 = vst [vmem:[#allocation7 + $0x10] sm:$0xff] %v51_v2  ;;  %v60_v3 = vld [vmem:[%s59_s4] sm:$0xff]  ;;  %s461_s5 = sshll.u32 %s460_s23, 3  ;;  %s68_s6 = scalar_lea.vmem [#allocation4], %s459_s3 }
  0x1f   :  { %62 = vst [vmem:[#allocation7 + $0x18] sm:$0xff] %v60_v3  ;;  %v69_v4 = vld [vmem:[%s68_s6] sm:$0xff]  ;;  %s463_s7 = sshll.u32 %s462_s25, 3  ;;  %s77_s8 = scalar_lea.vmem [#allocation4], %s461_s5 }
  0x20   :  { %71 = vst [vmem:[#allocation7 + $0x20] sm:$0xff] %v69_v4  ;;  %v78_v5 = vld [vmem:[%s77_s8] sm:$0xff]  ;;  %s464_s9 = sld [smem:[#allocation3 + $0x7]]  ;;  %s86_s10 = scalar_lea.vmem [#allocation4], %s463_s7 }
  0x21   :  { %80 = vst [vmem:[#allocation7 + $0x28] sm:$0xff] %v78_v5  ;;  %v87_v6 = vld [vmem:[%s86_s10] sm:$0xff]  ;;  %s466_s11 = sld [smem:[#allocation3 + $0x8]] }
  0x22   :  { %89 = vst [vmem:[#allocation7 + $0x30] sm:$0xff] %v87_v6  ;;  %s468_s12 = sld [smem:[#allocation3 + $0x9]] }
  0x23   :  { %s470_s13 = sld [smem:[#allocation3 + $0xa]] }
  0x24   :  { %s472_s14 = sld [smem:[#allocation3 + $0xb]] }
  0x25   :  { %s474_s0 = sld [smem:[#allocation3 + $0xc]] }
  0x26   :  { %s465_s17 = sshll.u32 %s464_s9, 3  ;;  %s476_s18 = sld [smem:[#allocation3 + $0xd]] }
  0x27   :  { %s467_s19 = sshll.u32 %s466_s11, 3  ;;  %s95_s20 = scalar_lea.vmem [#allocation4], %s465_s17 }
  0x28   :  { %v96_v7 = vld [vmem:[%s95_s20] sm:$0xff]  ;;  %s469_s21 = sshll.u32 %s468_s12, 3  ;;  %s104_s22 = scalar_lea.vmem [#allocation4], %s467_s19 }
  0x29   :  { %98 = vst [vmem:[#allocation7 + $0x38] sm:$0xff] %v96_v7  ;;  %v105_v8 = vld [vmem:[%s104_s22] sm:$0xff]  ;;  %s471_s23 = sshll.u32 %s470_s13, 3  ;;  %s113_s24 = scalar_lea.vmem [#allocation4], %s469_s21 }
  0x2a   :  { %107 = vst [vmem:[#allocation7 + $0x40] sm:$0xff] %v105_v8  ;;  %v114_v9 = vld [vmem:[%s113_s24] sm:$0xff]  ;;  %s473_s25 = sshll.u32 %s472_s14, 3  ;;  %s122_s26 = scalar_lea.vmem [#allocation4], %s471_s23 }
  0x2b   :  { %116 = vst [vmem:[#allocation7 + $0x48] sm:$0xff] %v114_v9  ;;  %v123_v10 = vld [vmem:[%s122_s26] sm:$0xff]  ;;  %s475_s27 = sshll.u32 %s474_s0, 3  ;;  %s131_s28 = scalar_lea.vmem [#allocation4], %s473_s25 }
  0x2c   :  { %125 = vst [vmem:[#allocation7 + $0x50] sm:$0xff] %v123_v10  ;;  %v132_v11 = vld [vmem:[%s131_s28] sm:$0xff]  ;;  %s477_s29 = sshll.u32 %s476_s18, 3  ;;  %s140_s30 = scalar_lea.vmem [#allocation4], %s475_s27 }
  0x2d   :  { %134 = vst [vmem:[#allocation7 + $0x58] sm:$0xff] %v132_v11  ;;  %v141_v12 = vld [vmem:[%s140_s30] sm:$0xff]  ;;  %s478_s1 = sld [smem:[#allocation3 + $0xe]]  ;;  %s149_s3 = scalar_lea.vmem [#allocation4], %s477_s29 }
  0x2e   :  { %143 = vst [vmem:[#allocation7 + $0x60] sm:$0xff] %v141_v12  ;;  %v150_v13 = vld [vmem:[%s149_s3] sm:$0xff]  ;;  %s480_s4 = sld [smem:[#allocation3 + $0xf]] }
  0x2f   :  { %152 = vst [vmem:[#allocation7 + $0x68] sm:$0xff] %v150_v13  ;;  %s482_s5 = sld [smem:[#allocation3 + $0x10]] }
  0x30   :  { %s484_s6 = sld [smem:[#allocation3 + $0x11]] }
  0x31   :  { %s486_s7 = sld [smem:[#allocation3 + $0x12]] }
  0x32   :  { %s488_s8 = sld [smem:[#allocation3 + $0x13]] }
  0x33   :  { %s479_s9 = sshll.u32 %s478_s1, 3  ;;  %s490_s10 = sld [smem:[#allocation3 + $0x14]] }
  0x34   :  { %s481_s11 = sshll.u32 %s480_s4, 3  ;;  %s158_s12 = scalar_lea.vmem [#allocation4], %s479_s9 }
  0x35   :  { %v159_v14 = vld [vmem:[%s158_s12] sm:$0xff]  ;;  %s483_s13 = sshll.u32 %s482_s5, 3  ;;  %s167_s14 = scalar_lea.vmem [#allocation4], %s481_s11 }
  0x36   :  { %161 = vst [vmem:[#allocation7 + $0x70] sm:$0xff] %v159_v14  ;;  %v168_v15 = vld [vmem:[%s167_s14] sm:$0xff]  ;;  %s485_s0 = sshll.u32 %s484_s6, 3  ;;  %s176_s17 = scalar_lea.vmem [#allocation4], %s483_s13 }
  0x37   :  { %170 = vst [vmem:[#allocation7 + $0x78] sm:$0xff] %v168_v15  ;;  %v177_v16 = vld [vmem:[%s176_s17] sm:$0xff]  ;;  %s487_s18 = sshll.u32 %s486_s7, 3  ;;  %s185_s19 = scalar_lea.vmem [#allocation4], %s485_s0 }
  0x38   :  { %179 = vst [vmem:[#allocation7 + $0x80] sm:$0xff] %v177_v16  ;;  %v186_v17 = vld [vmem:[%s185_s19] sm:$0xff]  ;;  %s489_s20 = sshll.u32 %s488_s8, 3  ;;  %s194_s21 = scalar_lea.vmem [#allocation4], %s487_s18 }
  0x39   :  { %188 = vst [vmem:[#allocation7 + $0x88] sm:$0xff] %v186_v17  ;;  %v195_v18 = vld [vmem:[%s194_s21] sm:$0xff]  ;;  %s491_s22 = sshll.u32 %s490_s10, 3  ;;  %s203_s23 = scalar_lea.vmem [#allocation4], %s489_s20 }
  0x3a   :  { %197 = vst [vmem:[#allocation7 + $0x90] sm:$0xff] %v195_v18  ;;  %v204_v19 = vld [vmem:[%s203_s23] sm:$0xff]  ;;  %s492_s24 = sld [smem:[#allocation3 + $0x15]]  ;;  %s212_s25 = scalar_lea.vmem [#allocation4], %s491_s22 }
  0x3b   :  { %206 = vst [vmem:[#allocation7 + $0x98] sm:$0xff] %v204_v19  ;;  %v213_v20 = vld [vmem:[%s212_s25] sm:$0xff]  ;;  %s494_s26 = sld [smem:[#allocation3 + $0x16]] }
  0x3c   :  { %215 = vst [vmem:[#allocation7 + $0xa0] sm:$0xff] %v213_v20  ;;  %s496_s27 = sld [smem:[#allocation3 + $0x17]] }
  0x3d   :  { %s498_s28 = sld [smem:[#allocation3 + $0x18]] }
  0x3e   :  { %s500_s29 = sld [smem:[#allocation3 + $0x19]] }
  0x3f   :  { %s502_s30 = sld [smem:[#allocation3 + $0x1a]] }
  0x40   :  { %s493_s1 = sshll.u32 %s492_s24, 3  ;;  %s504_s3 = sld [smem:[#allocation3 + $0x1b]] }
  0x41   :  { %s495_s4 = sshll.u32 %s494_s26, 3  ;;  %s221_s5 = scalar_lea.vmem [#allocation4], %s493_s1 }
  0x42   :  { %v222_v21 = vld [vmem:[%s221_s5] sm:$0xff]  ;;  %s497_s6 = sshll.u32 %s496_s27, 3  ;;  %s230_s7 = scalar_lea.vmem [#allocation4], %s495_s4 }
  0x43   :  { %224 = vst [vmem:[#allocation7 + $0xa8] sm:$0xff] %v222_v21  ;;  %v231_v22 = vld [vmem:[%s230_s7] sm:$0xff]  ;;  %s499_s8 = sshll.u32 %s498_s28, 3  ;;  %s239_s9 = scalar_lea.vmem [#allocation4], %s497_s6 }
  0x44   :  { %233 = vst [vmem:[#allocation7 + $0xb0] sm:$0xff] %v231_v22  ;;  %v240_v23 = vld [vmem:[%s239_s9] sm:$0xff]  ;;  %s501_s10 = sshll.u32 %s500_s29, 3  ;;  %s248_s11 = scalar_lea.vmem [#allocation4], %s499_s8 }
  0x45   :  { %242 = vst [vmem:[#allocation7 + $0xb8] sm:$0xff] %v240_v23  ;;  %v249_v24 = vld [vmem:[%s248_s11] sm:$0xff]  ;;  %s503_s12 = sshll.u32 %s502_s30, 3  ;;  %s257_s13 = scalar_lea.vmem [#allocation4], %s501_s10 }
  0x46   :  { %251 = vst [vmem:[#allocation7 + $0xc0] sm:$0xff] %v249_v24  ;;  %v258_v25 = vld [vmem:[%s257_s13] sm:$0xff]  ;;  %s505_s14 = sshll.u32 %s504_s3, 3  ;;  %s266_s0 = scalar_lea.vmem [#allocation4], %s503_s12 }
  0x47   :  { %260 = vst [vmem:[#allocation7 + $0xc8] sm:$0xff] %v258_v25  ;;  %v267_v26 = vld [vmem:[%s266_s0] sm:$0xff]  ;;  %s506_s17 = sld [smem:[#allocation3 + $0x1c]]  ;;  %s275_s18 = scalar_lea.vmem [#allocation4], %s505_s14 }
  0x48   :  { %269 = vst [vmem:[#allocation7 + $0xd0] sm:$0xff] %v267_v26  ;;  %v276_v27 = vld [vmem:[%s275_s18] sm:$0xff]  ;;  %s508_s19 = sld [smem:[#allocation3 + $0x1d]]  ;;  %s587_s12 = smov [#allocation7]  }
  0x49   :  { %278 = vst [vmem:[#allocation7 + $0xd8] sm:$0xff] %v276_v27  ;;  %s510_s20 = sld [smem:[#allocation3 + $0x1e]]  ;;  %s365_s13 = sshll.u32 %s587_s12, 4  ;;  %s366_s13 = int_to_ptr.vmem [resolvable:$true] %s365_s13 }
  0x4a   :  { %s512_s21 = sld [smem:[#allocation3 + $0x1f]]  ;;  %p562_p6 = scmp.lt.s32.totalorder %s366_s13, %s366_s13 }
  0x4b   :  { %s514_s22 = sld [smem:[#allocation3 + $0x20]] }
  0x4c   :  { %s516_s23 = sld [smem:[#allocation3 + $0x21]] }
  0x4d   :  { %s507_s24 = sshll.u32 %s506_s17, 3  ;;  %s518_s25 = sld [smem:[#allocation3 + $0x22]] }
  0x4e   :  { %s509_s26 = sshll.u32 %s508_s19, 3  ;;  %s284_s27 = scalar_lea.vmem [#allocation4], %s507_s24 }
  0x4f   :  { %v285_v28 = vld [vmem:[%s284_s27] sm:$0xff]  ;;  %s511_s28 = sshll.u32 %s510_s20, 3  ;;  %s293_s29 = scalar_lea.vmem [#allocation4], %s509_s26 }
  0x50   :  { %287 = vst [vmem:[#allocation7 + $0xe0] sm:$0xff] %v285_v28  ;;  %v294_v29 = vld [vmem:[%s293_s29] sm:$0xff]  ;;  %s513_s30 = sshll.u32 %s512_s21, 3  ;;  %s302_s1 = scalar_lea.vmem [#allocation4], %s511_s28 }
  0x51   :  { %296 = vst [vmem:[#allocation7 + $0xe8] sm:$0xff] %v294_v29  ;;  %v303_v30 = vld [vmem:[%s302_s1] sm:$0xff]  ;;  %s515_s3 = sshll.u32 %s514_s22, 3  ;;  %s311_s4 = scalar_lea.vmem [#allocation4], %s513_s30 }
  0x52   :  { %305 = vst [vmem:[#allocation7 + $0xf0] sm:$0xff] %v303_v30  ;;  %v312_v31 = vld [vmem:[%s311_s4] sm:$0xff]  ;;  %s517_s5 = sshll.u32 %s516_s23, 3  ;;  %s320_s6 = scalar_lea.vmem [#allocation4], %s515_s3 }
  0x53   :  { %314 = vst [vmem:[#allocation7 + $0xf8] sm:$0xff] %v312_v31  ;;  %v321_v32 = vld [vmem:[%s320_s6] sm:$0xff]  ;;  %s519_s7 = sshll.u32 %s518_s25, 3  ;;  %s329_s8 = scalar_lea.vmem [#allocation4], %s517_s5 }
  0x54   :  { %323 = vst [vmem:[#allocation7 + $0x100] sm:$0xff] %v321_v32  ;;  %v330_v33 = vld [vmem:[%s329_s8] sm:$0xff]  ;;  %s520_s9 = sld [smem:[#allocation3 + $0x23]]  ;;  %s338_s10 = scalar_lea.vmem [#allocation4], %s519_s7 }
  0x55   :  { %332 = vst [vmem:[#allocation7 + $0x108] sm:$0xff] %v330_v33  ;;  %v339_v34 = vld [vmem:[%s338_s10] sm:$0xff]  ;;  %s522_s11 = sld [smem:[#allocation3 + $0x24]]  ;;  %s557_s19 = scalar_lea.vmem %s366_s13, 4736 }
  0x56   :  { %341 = vst [vmem:[#allocation7 + $0x110] sm:$0xff] %v339_v34  ;;  %p558_p5 = scmp.ne.s32.totalorder %s366_s13, %s557_s19  ;;  %p563_p7 = scmp.lt.s32.totalorder %s557_s19, %s557_s19 }
  0x58   :  { %p564_p8 = por %p563_p7, %p562_p6 }
  0x5a   :  { %s521_s14 = sshll.u32 %s520_s9, 3  ;;  %p565_p9 = pnand %p564_p8, %p558_p5 }
  0x5b   :  { %s523_s0 = sshll.u32 %s522_s11, 3  ;;  %s347_s17 = scalar_lea.vmem [#allocation4], %s521_s14 }
  0x5c   :  { %v348_v35 = vld [vmem:[%s347_s17] sm:$0xff]  ;;  %s356_s18 = scalar_lea.vmem [#allocation4], %s523_s0 }
  0x5d   :  { %350 = vst [vmem:[#allocation7 + $0x118] sm:$0xff] %v348_v35  ;;  %v357_v36 = vld [vmem:[%s356_s18] sm:$0xff] }
  0x5e   :  { %359 = vst [vmem:[#allocation7 + $0x120] sm:$0xff] %v357_v36 }
  0x5f   :  { %568 = shalt.err (!%p565_p9)
}
  0x60   :  { %371 = dma.vmem_to_hbm [thread:$0]  %s366_s13, 4736, %s620_s2, [#allocation6], %s585_s15, %s585_s15, %s586_s16  }
  0x61   :  { %581 = dma.done.wait [#allocation6], 4736  }
  0x62   :  { %582 = vsyncadd [#allocation6], 4294962560 }
  0x63   :  { %375 = vsyncpa [#allocation5], 1 }
  0x64   :  { %376 = vsyncpa [#allocation6], 1 }

</bundles_post_ra>
